<compile_context>
chip_gen: v7x
topology: tpu7x:2x2x1
jax: 0.10.0
libtpu: 0.0.40
codegen_flags: <defaults>
</compile_context>

<pallas_src>
import math
from functools import partial

import jax
import jax.numpy as jnp
from jax.experimental import pallas as pl
from jax.experimental.pallas import tpu as pltpu


# ---------------------------------------------------------------------------
# Kernel 1: HybridFeatureExtractor head
#   concat([left, right], dim=1) -> 1x1 conv (bias=False) -> adaptive_avg_pool2d(1)
# ---------------------------------------------------------------------------
def _proj_pool_kernel(use_bf16, l_ref, r_ref, wl_ref, wr_ref, y_ref, g_ref):
    mm = jnp.bfloat16 if use_bf16 else jnp.float32
    xl = l_ref[0]                                              # (HW, C)
    xr = r_ref[0]                                              # (HW, C)
    y = jnp.dot(xl.astype(mm), wl_ref[...].astype(mm),
                preferred_element_type=jnp.float32)
    y = y + jnp.dot(xr.astype(mm), wr_ref[...].astype(mm),
                    preferred_element_type=jnp.float32)        # (HW, Cout)
    y_ref[...] = y.reshape(y_ref.shape).astype(y_ref.dtype)
    g_ref[...] = jnp.mean(y, axis=0).reshape(g_ref.shape).astype(g_ref.dtype)


def fused_projection_pool(left_feat, right_feat, w_proj, *, use_bf16_matmul=True):
    """left_feat/right_feat: (B, C, H, W); w_proj: (Cout, 2C) squeezed 1x1-conv weight.

    Returns (fused_feat_map (B, Cout, H, W), global_feat (B, Cout)).
    """
    B, C, H, W = left_feat.shape
    Cout = w_proj.shape[0]
    HW = H * W

    # Channels-last so every matmul / store is lane-dense.
    xl = jnp.transpose(left_feat.reshape(B, C, HW), (0, 2, 1))   # (B, HW, C)
    xr = jnp.transpose(right_feat.reshape(B, C, HW), (0, 2, 1))
    wl_t = w_proj[:, :C].T                                       # (C, Cout)
    wr_t = w_proj[:, C:].T                                       # (C, Cout)

    kernel = partial(_proj_pool_kernel, use_bf16_matmul)
    full2d = lambda b: (0, 0)
    # TODO(synk): for production shapes (C=Cout=2048, HW~225) tile HW and Cout instead
    # of taking whole-batch blocks.
    y, g = pl.pallas_call(
        kernel,
        out_shape=(jax.ShapeDtypeStruct((B, HW, Cout), left_feat.dtype),
                   jax.ShapeDtypeStruct((B, 1, Cout), left_feat.dtype)),
        grid_spec=pltpu.PrefetchScalarGridSpec(
            num_scalar_prefetch=0,
            grid=(B,),
            in_specs=[
                pl.BlockSpec((1, HW, C), lambda b: (b, 0, 0)),
                pl.BlockSpec((1, HW, C), lambda b: (b, 0, 0)),
                pl.BlockSpec((C, Cout), full2d),
                pl.BlockSpec((C, Cout), full2d),
            ],
            out_specs=(pl.BlockSpec((1, HW, Cout), lambda b: (b, 0, 0)),
                       pl.BlockSpec((1, 1, Cout), lambda b: (b, 0, 0))),
        ),
        compiler_params=pltpu.CompilerParams(
            dimension_semantics=("parallel",)),
    )(xl, xr, wl_t, wr_t)

    fused_map = jnp.transpose(y, (0, 2, 1)).reshape(B, Cout, H, W)
    return fused_map, g.reshape(B, Cout)


# ---------------------------------------------------------------------------
# Kernel 2: CrossAttention fusion block (MultiheadAttention + residual*scale + LayerNorm)
# ---------------------------------------------------------------------------
def _cross_attn_kernel(num_heads, head_dim, eps, use_bf16,
                       q_ref, k_ref,
                       wq_ref, wkv_ref, bq_ref, bkv_ref,
                       wo_ref, bo_ref, gamma_ref, beta_ref, scale_ref,
                       o_ref):
    bn, L, E = q_ref.shape            # (Bn, L, E) batch-major block
    S = k_ref.shape[1]
    mm = jnp.bfloat16 if use_bf16 else jnp.float32

    # (Bn, L, E) -> (Bn*L, E): free leading-dim merge; MXU M-dim = Bn*L (>= 128).
    q2 = q_ref[...].reshape(bn * L, E)
    k2 = k_ref[...].reshape(bn * S, E)

    # Input projections with pre-transposed weights; K/V fused into one MXU pass.
    q_p = jnp.dot(q2.astype(mm), wq_ref[...].astype(mm),
                  preferred_element_type=jnp.float32) + bq_ref[...]
    kv = jnp.dot(k2.astype(mm), wkv_ref[...].astype(mm),
                 preferred_element_type=jnp.float32) + bkv_ref[...]

    q_p = q_p.reshape(bn, L, E)
    k_p = kv[:, :E].reshape(bn, S, E)
    v_p = kv[:, E:].reshape(bn, S, E)

    # Static per-head loop; head merge is folded into the output projection by
    # accumulating ctx_h @ wo_t[h*Dh:(h+1)*Dh, :] -- no split_heads concats.
    sm_scale = 1.0 / math.sqrt(head_dim)
    attn = jnp.zeros((bn * L, E), jnp.float32)
    for h in range(num_heads):
        lo = h * head_dim
        qh = q_p[:, :, lo:lo + head_dim]
        kh = k_p[:, :, lo:lo + head_dim]
        vh = v_p[:, :, lo:lo + head_dim]
        s = jnp.einsum("bld,bsd->bls", qh.astype(mm), kh.astype(mm),
                       preferred_element_type=jnp.float32) * sm_scale   # (bn, L, S)
        # NOTE: S is lane-sparse at demo scale (S=8); pad/pack S to a multiple of 128
        # in production for dense softmax vregs and unmasked stores.
        m = jnp.max(s, axis=-1, keepdims=True)
        p = jnp.exp(s - m)
        denom = jnp.sum(p, axis=-1, keepdims=True)
        if use_bf16:
            p = p * pl.reciprocal(denom, approx=True)   # EUP slot, off the VALU
        else:
            p = p / denom                               # exact f32 reference parity
        ctx = jnp.einsum("bls,bsd->bld", p.astype(mm), vh.astype(mm),
                         preferred_element_type=jnp.float32)            # (bn, L, Dh)
        attn = attn + jnp.dot(ctx.reshape(bn * L, head_dim).astype(mm),
                              wo_ref[lo:lo + head_dim, :].astype(mm),
                              preferred_element_type=jnp.float32)
    attn = attn + bo_ref[...]

    # torch.nan_to_num(nan=0.0, posinf=1.0, neginf=-1.0)
    attn = jnp.where(jnp.isnan(attn), 0.0, attn)
    attn = jnp.where(jnp.isinf(attn), jnp.where(attn > 0, 1.0, -1.0), attn)

    # Scaled residual + LayerNorm over the last dim (f32 VPU math on all generations).
    scale = scale_ref[0]                       # scalar from SMEM
    res = q2 + scale * attn
    mean = jnp.mean(res, axis=-1, keepdims=True)
    cen = res - mean
    var = jnp.mean(cen * cen, axis=-1, keepdims=True)
    y = cen * jax.lax.rsqrt(var + eps) * gamma_ref[...] + beta_ref[...]

    o_ref[...] = y.reshape(bn, L, E).astype(o_ref.dtype)


def cross_attention(query, key, params, *, num_heads, block_batch=None,
                    use_bf16_matmul=True):
    """query: (L, N, E), key: (S, N, E) -> (L, N, E).  Eval semantics (dropout=identity)."""
    L, N, E = query.shape
    S = key.shape[0]
    assert E % num_heads == 0
    head_dim = E // num_heads

    # Batch-group size: target MXU M-dim (bn*L) >= 128.  On v7x pass block_batch=N//2
    # so the parallel grid keeps 2 steps (one per TensorCore).
    if block_batch is None:
        bn = min(max(1, (128 + L - 1) // L), N)
    else:
        bn = min(max(1, block_batch), N)

    # Batch-major copies (per-batch attention needs batch-contiguous rows; Mosaic has no
    # general in-kernel transpose).  TODO(synk): at large N*L*E consume (L,N,E) directly
    # to drop these HBM round-trips.
    q_b = jnp.transpose(query, (1, 0, 2))       # (N, L, E)
    k_b = jnp.transpose(key, (1, 0, 2))         # (N, S, E)

    # Pad N up to a multiple of bn (instead of degrading bn for awkward/prime N);
    # padded rows are sliced off the output.
    n_pad = (-N) % bn
    if n_pad:
        q_b = jnp.concatenate([q_b, jnp.zeros((n_pad, L, E), q_b.dtype)], axis=0)
        k_b = jnp.concatenate([k_b, jnp.zeros((n_pad, S, E), k_b.dtype)], axis=0)
    n_total = N + n_pad

    # One-time weight plumbing: pre-transpose everything, fuse the K/V projection.
    wq_t = params["wq"].T                                               # (E, E)
    wkv_t = jnp.concatenate([params["wk"], params["wv"]], axis=0).T     # (E, 2E)
    bkv = jnp.concatenate([params["bk"], params["bv"]], axis=-1)        # (1, 2E)
    wo_t = params["wo"].T                                               # (E, E)
    bq, bo = params["bq"], params["bo"]                                 # (1, E)
    gamma, beta = params["gamma"], params["beta"]                       # (1, E)
    scale = params["scale"].reshape((1,)).astype(jnp.float32)           # (1,) -> SMEM

    # Resident weights: single-buffer once they dominate VMEM (E >= 512) -- matters on
    # v7x's 64 MiB VMEM; default double-buffering is harmless below that.
    def w_spec(shape):
        if E >= 512:
            return pl.BlockSpec(shape, lambda b: (0, 0), pipeline_mode=pl.Buffered(1))
        return pl.BlockSpec(shape, lambda b: (0, 0))

    # VMEM budget from actual block sizes + rough intermediate estimate; capped at
    # 48 MiB to leave compiler-scratch headroom on v7x.
    f32 = 4
    act_bytes = 2 * (2 * bn * L * E + bn * S * E) * f32          # dbl-buffered q/out + k
    w_bytes = 2 * (4 * E * E + 7 * E) * f32                      # wq + wkv + wo + vectors
    tmp_bytes = (3 * bn * L * E + 3 * bn * S * E) * f32          # q_p / kv / attn temps
    vmem_limit = int(min(max(act_bytes + w_bytes + tmp_bytes, 32 << 20), 48 << 20))

    kernel = partial(_cross_attn_kernel, num_heads, head_dim, 1e-5, use_bf16_matmul)

    out = pl.pallas_call(
        kernel,
        out_shape=jax.ShapeDtypeStruct((n_total, L, E), query.dtype),
        grid_spec=pltpu.PrefetchScalarGridSpec(
            num_scalar_prefetch=0,
            grid=(n_total // bn,),
            in_specs=[
                pl.BlockSpec((bn, L, E), lambda b: (b, 0, 0)),   # query batch group
                pl.BlockSpec((bn, S, E), lambda b: (b, 0, 0)),   # key batch group
                w_spec((E, E)),                                  # wq (pre-transposed)
                w_spec((E, 2 * E)),                              # wk|wv fused (pre-T)
                pl.BlockSpec((1, E), lambda b: (0, 0)),          # bq
                pl.BlockSpec((1, 2 * E), lambda b: (0, 0)),      # bk|bv fused
                w_spec((E, E)),                                  # wo (pre-transposed)
                pl.BlockSpec((1, E), lambda b: (0, 0)),          # bo
                pl.BlockSpec((1, E), lambda b: (0, 0)),          # gamma
                pl.BlockSpec((1, E), lambda b: (0, 0)),          # beta
                pl.BlockSpec(memory_space=pltpu.SMEM),           # scale (scalar path)
            ],
            out_specs=pl.BlockSpec((bn, L, E), lambda b: (b, 0, 0)),
        ),
        compiler_params=pltpu.CompilerParams(
            dimension_semantics=("parallel",),
            vmem_limit_bytes=vmem_limit),
    )(q_b, k_b, wq_t, wkv_t, bq, bkv, wo_t, bo, gamma, beta, scale)

    out = out[:N]
    return jnp.transpose(out, (1, 0, 2))   # back to (L, N, E)


def init_params(key, dim):
    ks = jax.random.split(key, 4)
    std = 1.0 / math.sqrt(dim)
    wq = jax.random.uniform(ks[0], (dim, dim), jnp.float32, -std, std)
    wk = jax.random.uniform(ks[1], (dim, dim), jnp.float32, -std, std)
    wv = jax.random.uniform(ks[2], (dim, dim), jnp.float32, -std, std)
    wo = jax.random.uniform(ks[3], (dim, dim), jnp.float32, -std, std)
    return {
        "wq": wq, "wk": wk, "wv": wv,
        "bq": jnp.zeros((1, dim), jnp.float32),
        "bk": jnp.zeros((1, dim), jnp.float32),
        "bv": jnp.zeros((1, dim), jnp.float32),
        "wo": wo,
        "bo": jnp.zeros((1, dim), jnp.float32),
        "gamma": jnp.ones((1, dim), jnp.float32),      # LayerNorm weight
        "beta": jnp.zeros((1, dim), jnp.float32),      # LayerNorm bias
        "scale": jnp.full((1,), 0.1, jnp.float32),     # learnable residual scale
    }
    # TODO(synk): dropout inside nn.MultiheadAttention is training-only; eval semantics.


if __name__ == "__main__":
    root = jax.random.PRNGKey(0)
    k_lf, k_rf, k_w, k_p, k_q, k_k = jax.random.split(root, 6)

    # --- HybridFeatureExtractor head: concat + 1x1-conv projection + global avg pool ---
    # TODO(synk): EfficientNet-b5 extract_features (pretrained conv stack) stays in XLA;
    # small random stand-in backbone feature maps are used here (real: C=Cout=2048).
    B, C, H, W, Cout = 2, 256, 8, 8, 256
    left_feat = jax.random.normal(k_lf, (B, C, H, W), jnp.float32)
    right_feat = jax.random.normal(k_rf, (B, C, H, W), jnp.float32)
    w_proj = jax.random.normal(k_w, (Cout, 2 * C), jnp.float32) / math.sqrt(2 * C)
    fused_map, global_feat = fused_projection_pool(left_feat, right_feat, w_proj)
    fused_map, global_feat = jax.block_until_ready((fused_map, global_feat))
    assert fused_map.shape == (B, Cout, H, W)
    assert global_feat.shape == (B, Cout)

    # --- CrossAttention fusion block of the model file (improved per perf review) ---
    dim, num_heads = 128, 4            # E multiple of 128 -> lane-dense blocks
    L, S, N = 8, 8, 16                 # auto bn=16 -> MXU M-dim 128, grid=(1,)
    params = init_params(k_p, dim)
    query = jax.random.normal(k_q, (L, N, dim), jnp.float32)
    key_t = jax.random.normal(k_k, (S, N, dim), jnp.float32)
    out = cross_attention(query, key_t, params, num_heads=num_heads)
    out = jax.block_until_ready(out)
    assert out.shape == (L, N, dim)

    print("KERNEL_OK")
</pallas_src>

<mosaic_0001>
module attributes {stable_mosaic.version = 11 : i64} {
  func.func @_proj_pool_kernel(%arg0: i32, %arg1: memref<1x64x256xf32, #tpu.memory_space<vmem>>, %arg2: memref<1x64x256xf32, #tpu.memory_space<vmem>>, %arg3: memref<256x256xf32, #tpu.memory_space<vmem>>, %arg4: memref<256x256xf32, #tpu.memory_space<vmem>>, %arg5: memref<1x64x256xf32, #tpu.memory_space<vmem>>, %arg6: memref<1x1x256xf32, #tpu.memory_space<vmem>>) attributes {dimension_semantics = [#tpu.dimension_semantics<parallel>], iteration_bounds = array<i64: 2>, scalar_prefetch = 0 : i64, scratch_operands = 0 : i64, tpu.core_type = #tpu.core_type<tc>, window_params = [{transform_indices = @transform_0, window_bounds = array<i64: 1, 64, 256>}, {transform_indices = @transform_1, window_bounds = array<i64: 1, 64, 256>}, {pipeline_mode = #tpu.pipeline_mode<synchronous>, transform_indices = @transform_2, window_bounds = array<i64: 256, 256>}, {pipeline_mode = #tpu.pipeline_mode<synchronous>, transform_indices = @transform_3, window_bounds = array<i64: 256, 256>}, {transform_indices = @transform_4, window_bounds = array<i64: 1, 64, 256>}, {transform_indices = @transform_5, window_bounds = array<i64: 1, 1, 256>}]} {
    %c0 = arith.constant 0 : index
    %c0_0 = arith.constant 0 : index
    %c0_1 = arith.constant 0 : index
    %0 = vector.load %arg1[%c0, %c0_0, %c0_1] : memref<1x64x256xf32, #tpu.memory_space<vmem>>, vector<1x64x256xf32>
    %1 = vector.shape_cast %0 : vector<1x64x256xf32> to vector<64x256xf32>
    %c0_2 = arith.constant 0 : index
    %c0_3 = arith.constant 0 : index
    %c0_4 = arith.constant 0 : index
    %2 = vector.load %arg2[%c0_2, %c0_3, %c0_4] : memref<1x64x256xf32, #tpu.memory_space<vmem>>, vector<1x64x256xf32>
    %3 = vector.shape_cast %2 : vector<1x64x256xf32> to vector<64x256xf32>
    %4 = arith.truncf %1 : vector<64x256xf32> to vector<64x256xbf16>
    %c0_5 = arith.constant 0 : index
    %c0_6 = arith.constant 0 : index
    %5 = vector.load %arg3[%c0_5, %c0_6] : memref<256x256xf32, #tpu.memory_space<vmem>>, vector<256x256xf32>
    %6 = arith.truncf %5 : vector<256x256xf32> to vector<256x256xbf16>
    %cst = arith.constant dense<0.000000e+00> : vector<64x256xf32>
    %7 = tpu.matmul %4, %6, %cst {dimension_numbers = #tpu.dot_dimension_numbers<[1], [0], [0], [1], [0, 0, 1, 1], [], []>} : vector<64x256xbf16>, vector<256x256xbf16>, vector<64x256xf32> -> vector<64x256xf32>
    %8 = arith.truncf %3 : vector<64x256xf32> to vector<64x256xbf16>
    %c0_7 = arith.constant 0 : index
    %c0_8 = arith.constant 0 : index
    %9 = vector.load %arg4[%c0_7, %c0_8] : memref<256x256xf32, #tpu.memory_space<vmem>>, vector<256x256xf32>
    %10 = arith.truncf %9 : vector<256x256xf32> to vector<256x256xbf16>
    %cst_9 = arith.constant dense<0.000000e+00> : vector<64x256xf32>
    %11 = tpu.matmul %8, %10, %cst_9 {dimension_numbers = #tpu.dot_dimension_numbers<[1], [0], [0], [1], [0, 0, 1, 1], [], []>} : vector<64x256xbf16>, vector<256x256xbf16>, vector<64x256xf32> -> vector<64x256xf32>
    %12 = arith.addf %7, %11 : vector<64x256xf32>
    %13 = vector.shape_cast %12 : vector<64x256xf32> to vector<1x64x256xf32>
    %c0_10 = arith.constant 0 : index
    %c0_11 = arith.constant 0 : index
    %c0_12 = arith.constant 0 : index
    %14 = vector.load %arg5[%c0_10, %c0_11, %c0_12] : memref<1x64x256xf32, #tpu.memory_space<vmem>>, vector<1x64x256xf32>
    tpu.vector_store %arg5[%c0_10, %c0_11, %c0_12], %13 {strides = array<i32>} : memref<1x64x256xf32, #tpu.memory_space<vmem>>, vector<1x64x256xf32>,
    %cst_13 = arith.constant dense<0.000000e+00> : vector<256xf32>
    %15 = vector.multi_reduction <add>, %12, %cst_13 [0] : vector<64x256xf32> to vector<256xf32>
    %cst_14 = arith.constant 6.400000e+01 : f32
    %16 = vector.broadcast %cst_14 : f32 to vector<256xf32>
    %17 = arith.divf %15, %16 : vector<256xf32>
    %18 = vector.shape_cast %17 : vector<256xf32> to vector<1x1x256xf32>
    %c0_15 = arith.constant 0 : index
    %c0_16 = arith.constant 0 : index
    %c0_17 = arith.constant 0 : index
    %19 = vector.load %arg6[%c0_15, %c0_16, %c0_17] : memref<1x1x256xf32, #tpu.memory_space<vmem>>, vector<1x1x256xf32>
    tpu.vector_store %arg6[%c0_15, %c0_16, %c0_17], %18 {strides = array<i32>} : memref<1x1x256xf32, #tpu.memory_space<vmem>>, vector<1x1x256xf32>,
    return
  }
  func.func @transform_0(%arg0: i32) -> (i32, i32, i32) {
    %c0_i32 = arith.constant 0 : i32
    %c0_i32_0 = arith.constant 0 : i32
    %c0_i32_1 = arith.constant 0 : i32
    return %arg0, %c0_i32, %c0_i32_0 : i32, i32, i32
  }
  func.func @transform_1(%arg0: i32) -> (i32, i32, i32) {
    %c0_i32 = arith.constant 0 : i32
    %c0_i32_0 = arith.constant 0 : i32
    %c0_i32_1 = arith.constant 0 : i32
    return %arg0, %c0_i32, %c0_i32_0 : i32, i32, i32
  }
  func.func @transform_2(%arg0: i32) -> (i32, i32) {
    %c0_i32 = arith.constant 0 : i32
    %c0_i32_0 = arith.constant 0 : i32
    %c0_i32_1 = arith.constant 0 : i32
    return %c0_i32, %c0_i32_0 : i32, i32
  }
  func.func @transform_3(%arg0: i32) -> (i32, i32) {
    %c0_i32 = arith.constant 0 : i32
    %c0_i32_0 = arith.constant 0 : i32
    %c0_i32_1 = arith.constant 0 : i32
    return %c0_i32, %c0_i32_0 : i32, i32
  }
  func.func @transform_4(%arg0: i32) -> (i32, i32, i32) {
    %c0_i32 = arith.constant 0 : i32
    %c0_i32_0 = arith.constant 0 : i32
    %c0_i32_1 = arith.constant 0 : i32
    return %arg0, %c0_i32, %c0_i32_0 : i32, i32, i32
  }
  func.func @transform_5(%arg0: i32) -> (i32, i32, i32) {
    %c0_i32 = arith.constant 0 : i32
    %c0_i32_0 = arith.constant 0 : i32
    %c0_i32_1 = arith.constant 0 : i32
    return %arg0, %c0_i32, %c0_i32_0 : i32, i32, i32
  }
}

</mosaic_0001>

<bundles_post_ra>
// kernel: tpu_custom_call.1
= control target key start
LH: loop header
LB: loop body
LE: loop exit
PB: predicated region body
PF: predicated region fallthrough
CT: control target
= control target key end

     0   :  { %s1737_s0 = inlined_call_operand.hbm [shape: f32[2,64,256], index: 0, kind: input, shape index: {}]   ;;  %s1738_s1 = inlined_call_operand.hbm [shape: f32[2,64,256], index: 1, kind: input, shape index: {}]   ;;  %s1739_s2 = inlined_call_operand.hbm [shape: f32[256,256], index: 2, kind: input, shape index: {}]   ;;  %s1740_s3 = inlined_call_operand.hbm [shape: f32[256,256], index: 3, kind: input, shape index: {}]   ;;  %s1741_s4 = inlined_call_operand.hbm [shape: f32[2,64,256], index: 4, kind: output, shape index: {0}]   ;;  %s1742_s5 = inlined_call_operand.hbm [shape: f32[2,1,256], index: 5, kind: output, shape index: {1}]  }
   0x1   :  { %1750 = sst [smem:[#allocation19_spill]] %s1737_s0 }
   0x2   :  { %1751 = sst [smem:[#allocation20_spill]] %s1739_s2 }
   0x3   :  { %11 = vsyncpa [#allocation3], 0 }
   0x4   :  { %13 = vsyncpa [#allocation3 + $0x1], 0 }
   0x5   :  { %14 = vsyncpa [#allocation6], 0 }
   0x6   :  { %16 = vsyncpa [#allocation6 + $0x1], 0 }
   0x7   :  { %17 = vsyncpa [#allocation9], 0 }
   0x8   :  { %18 = vsyncpa [#allocation4], 0 }
   0x9   :  { %20 = vsyncpa [#allocation4 + $0x1], 0 }
   0xa   :  { %21 = vsyncpa [#allocation12], 0 }
   0xb   :  { %23 = vsyncpa [#allocation12 + $0x1], 0  ;;  %s1354_s18 = smov 0   ;;  %s1356_s19 = smov 0  }
   0xc   :  { %s1358_s20 = smov 0   ;;  %s1360_s21 = smov 0  }
   0xd LB: > { %s1375_s22 = sadd.s32 4294967295, %s1311_s21   ;;  %s957_s23 = sadd.s32 4294967294, %s1311_s21   ;;  %s1311_s21 = sphi %s1360_s21, %s1774_s21   ;;  %s1307_s20 = sphi %s1358_s20, %s1773_s20   ;;  %s1303_s19 = sphi %s1356_s19, %s1772_s19   ;;  %s1299_s18 = sphi %s1354_s18, %s1771_s18  }
   0xe   : > { %p49_p0 = scmp.ne.s32.totalorder %s1303_s19, %s1299_s18  ;;  %p1743_p1 = scmp.eq.s32.totalorder %s1375_s22, 0 }
   0xf   : > { %p147_p3 = scmp.eq.s32.totalorder %s957_s23, 1  ;;  %p958_p5 = scmp.ge.s32.totalorder %s1311_s21, 1 }
  0x10   : > { %p1384_p4 = por %p1743_p1, %p49_p0  ;;  %p180_p7 = scmp.lt.s32.totalorder %s1311_s21, 3 }
  0x11   : > { %p1389_p6 = por %p147_p3, %p49_p0  ;;  %s1313_s27 = smov [#allocation7]  }
  0x12   : > { %s1752_s24 = scalar_select %p1384_p4, 1, 0 }
  0x13   : > { %s1753_s25 = scalar_select %p1389_p6, 1, 0 }
  0x14   : > { %p1394_p8 = pnand %p958_p5, %p180_p7  ;;  %s192_s28 = sshll.u32 %s1313_s27, 4  ;;  %s1398_s28 = int_to_ptr.vmem [resolvable:$true] %s192_s28 }
  0x15   : > { %s1314_s30 = smov [#allocation8]   ;;  %s1756_s2 = sld [smem:[#allocation20_spill]] }
  0x16   : > { %p1019_p9 = pneg %p1394_p8  ;;  %s205_s6 = sshll.u32 %s1314_s30, 4  ;;  %s1409_s6 = int_to_ptr.vmem [resolvable:$true] %s205_s6 }
  0x18   : > { %p1405_p11 = pnand %p1019_p9, %p1743_p1 }
  0x1a   : > { %p1087_p13 = pneg %p1405_p11 }
  0x1b   : > { %s1085_s9 = scalar_lea.hbm %s1756_s2, 8192 }
  0x1c   : > { %p1086_p12 = scmp.ne.s32.totalorder %s1756_s2, %s1085_s9  ;;  %p1092_p5 = scmp.lt.u32.totalorder %s1085_s9, %s1756_s2 }
  0x1e   : > { %p1088_p0 = pnand %p1087_p13, %p1086_p12 }
  0x20   : > { %p1089_p3 = pneg %p1088_p0 }
  0x22   : > { %p1094_p7 = pnand %p1092_p5, %p1089_p3 }
  0x24   : > { %1097 = shalt.err (!%p1094_p7)
}
  0x25   : > { %s1098_s14 = scalar_lea.vmem %s1398_s28, 8192  ;;  %p1106_p2 = scmp.lt.s32.totalorder %s1398_s28, %s1398_s28 }
  0x26   : > { %p1099_p9 = scmp.ne.s32.totalorder %s1398_s28, %s1098_s14  ;;  %p1107_p12 = scmp.lt.s32.totalorder %s1098_s14, %s1098_s14 }
  0x28   : > { %p1101_p10 = pnand %p1099_p9, %p1087_p13  ;;  %p1108_p0 = por %p1107_p12, %p1106_p2 }
  0x2a   : > { %p1102_p1 = pneg %p1101_p10 }
  0x2c   : > { %p1109_p6 = pnand %p1108_p0, %p1102_p1 }
  0x2e   : > { %1112 = shalt.err (!%p1109_p6)
}
  0x2f   : > { %s1744_s15 = smov 256   ;;  %s1746_s16 = smov 16  }
  0x30   : > { %1022 = dma.hbm_to_vmem [thread:$0]  (!%p1405_p11), %s1756_s2, 8192, %s1398_s28, [#allocation6], %s1744_s15, %s1744_s15, %s1746_s16  }
  0x31   : > { %s1113_s7 = scalar_lea.hbm %s1740_s3, 8192 }
  0x32   : > { %p1114_p1 = scmp.ne.s32.totalorder %s1740_s3, %s1113_s7  ;;  %p1120_p10 = scmp.lt.u32.totalorder %s1113_s7, %s1740_s3 }
  0x34   : > { %p1116_p2 = pnand %p1114_p1, %p1087_p13 }
  0x36   : > { %p1117_p6 = pneg %p1116_p2 }
  0x38   : > { %p1122_p3 = pnand %p1120_p10, %p1117_p6 }
  0x3a   : > { %1125 = shalt.err (!%p1122_p3)
}
  0x3b   : > { %s1126_s28 = scalar_lea.vmem %s1409_s6, 8192  ;;  %p1134_p12 = scmp.lt.s32.totalorder %s1409_s6, %s1409_s6 }
  0x3c   : > { %p1127_p5 = scmp.ne.s32.totalorder %s1409_s6, %s1126_s28  ;;  %p1135_p0 = scmp.lt.s32.totalorder %s1126_s28, %s1126_s28 }
  0x3e   : > { %p1129_p7 = pnand %p1127_p5, %p1087_p13  ;;  %p1136_p1 = por %p1135_p0, %p1134_p12 }
  0x40   : > { %p1130_p9 = pneg %p1129_p7 }
  0x42   : > { %p1137_p2 = pnand %p1136_p1, %p1130_p9 }
  0x44   : > { %1140 = shalt.err (!%p1137_p2)
}
  0x45   : > { %1025 = dma.hbm_to_vmem [thread:$0]  (!%p1405_p11), %s1740_s3, 8192, %s1409_s6, [#allocation9], %s1744_s15, %s1744_s15, %s1746_s16  }
  0x46   : > { %s1470_s29 = sadd.s32 1, %s1311_s21   ;;  %s36_s14 = sadd.s32 1, %s1307_s20 }
  0x47   : > { %s33_s17 = ssub.s32 %s1311_s21, %s1470_s29  ;;  %p43_p13 = scmp.ne.s32.totalorder %s1307_s20, %s1303_s19 }
  0x48   : > { %p34_p6 = scmp.eq.s32.totalorder %s33_s17, 0  ;;  %p44_p10 = scmp.eq.s32.totalorder %s1311_s21, 0 }
  0x49   : > { %p1757_p3 = scmp.eq.s32.totalorder %s1375_s22, 1  ;;  %p1042_p7 = scmp.lt.s32.totalorder %s1311_s21, 2 }
  0x4a   : > { %s1486_s27 = scalar_select %p34_p6, %s1307_s20, %s36_s14  }
  0x4b   : > { %p1480_p5 = por %p1757_p3, %p43_p13  ;;  %p45_p9 = por %p44_p10, %p43_p13 }
  0x4c   : > { %s219_s30 = sand.u32 1, %s1307_s20   ;;  %s983_s6 = sshll.u32 %s1311_s21, 11 }
  0x4d   : > { %s1758_s23 = scalar_select %p1480_p5, 1, 0 }
  0x4e   : > { %s962_s7 = sshll.u32 %s219_s30, 7  ;;  %s1759_s0 = sld [smem:[#allocation19_spill]] }
  0x4f   : > { %s223_s11 = scalar_lea.vmem [#allocation2], %s962_s7  ;;  %p1497_p11 = pnand %p1042_p7, %p45_p9 }
  0x50   : > { %s230_s28 = sshll.u32 %s223_s11, 4  ;;  %s1504_s17 = scalar_lea.hbm %s1738_s1, %s983_s6  ;;  %s1495_s28 = int_to_ptr.vmem [resolvable:$true] %s230_s28 }
  0x51   : > { %s244_s8 = scalar_lea.vmem [#allocation5], %s962_s7  ;;  %s1508_s15 = scalar_lea.sflag [#allocation3], %s219_s30 }
  0x52   : > { %s1506_s9 = sshll.u32 %s244_s8, 4  ;;  %p1143_p0 = pneg %p1497_p11  ;;  %s1540_s9 = int_to_ptr.vmem [resolvable:$true] %s1506_s9 }
  0x54   : > { %s1493_s10 = scalar_lea.hbm %s1759_s0, %s983_s6  ;;  %s1146_s13 = scalar_lea.hbm %s1759_s0, 4096 }
  0x55   : > { %s1141_s11 = scalar_lea.hbm %s1493_s10, 2048  ;;  %p1147_p13 = scmp.lt.u32.totalorder %s1493_s10, %s1759_s0 }
  0x56   : > { %p1142_p12 = scmp.ne.s32.totalorder %s1493_s10, %s1141_s11  ;;  %p1148_p6 = scmp.lt.u32.totalorder %s1146_s13, %s1141_s11 }
  0x57   : > { %p1150_p3 = scmp.lt.u32.totalorder %s1141_s11, %s1493_s10 }
  0x58   : > { %p1144_p1 = pnand %p1143_p0, %p1142_p12  ;;  %p1149_p10 = por %p1148_p6, %p1147_p13 }
  0x5a   : > { %p1145_p2 = pneg %p1144_p1  ;;  %p1151_p7 = por %p1150_p3, %p1149_p10 }
  0x5c   : > { %p1152_p9 = pnand %p1151_p7, %p1145_p2 }
  0x5e   : > { %1155 = shalt.err (!%p1152_p9)
}
  0x5f   : > { %s1156_s30 = scalar_lea.vmem %s1495_s28, 2048  ;;  %s1317_s2 = smov [#allocation2]  }
  0x60   : > { %p1157_p12 = scmp.ne.s32.totalorder %s1495_s28, %s1156_s30  ;;  %s1161_s16 = sshll.u32 %s1317_s2, 4  ;;  %s1162_s16 = int_to_ptr.vmem [resolvable:$false] %s1161_s16 }
  0x61   : > { %s1163_s7 = scalar_lea.vmem %s1162_s16, 4096  ;;  %p1164_p4 = scmp.lt.s32.totalorder %s1495_s28, %s1162_s16 }
  0x62   : > { %p1159_p1 = pnand %p1157_p12, %p1143_p0  ;;  %p1165_p13 = scmp.lt.s32.totalorder %s1163_s7, %s1156_s30 }
  0x64   : > { %p1160_p5 = pneg %p1159_p1  ;;  %p1166_p6 = por %p1165_p13, %p1164_p4 }
  0x66   : > { %p1167_p10 = pnand %p1166_p6, %p1160_p5 }
  0x68   : > { %1170 = shalt.err (!%p1167_p10)
}
  0x69   : > { %s1761_s8 = smov 16   ;;  %s1762_s11 = smov 256  }
  0x6a   : > { %1029 = dma.hbm_to_vmem [thread:$0]  (!%p1497_p11), %s1493_s10, 2048, %s1495_s28, %s1508_s15, %s1762_s11, %s1762_s11, %s1761_s8  }
  0x6b   : > { %s240_s13 = sand.u32 1, %s1311_s21   ;;  %s1171_s6 = scalar_lea.hbm %s1504_s17, 2048 }
  0x6c   : > { %s1543_s14 = scalar_lea.sflag [#allocation6], %s240_s13  ;;  %p1172_p4 = scmp.ne.s32.totalorder %s1504_s17, %s1171_s6 }
  0x6d   : > { %s1176_s16 = scalar_lea.hbm %s1738_s1, 4096  ;;  %p1177_p3 = scmp.lt.u32.totalorder %s1504_s17, %s1738_s1 }
  0x6e   : > { %p1174_p5 = pnand %p1172_p4, %p1143_p0  ;;  %p1178_p7 = scmp.lt.u32.totalorder %s1176_s16, %s1171_s6 }
  0x6f   : > { %p1180_p12 = scmp.lt.u32.totalorder %s1171_s6, %s1504_s17 }
  0x70   : > { %p1175_p2 = pneg %p1174_p5  ;;  %p1179_p9 = por %p1178_p7, %p1177_p3 }
  0x72   : > { %p1181_p1 = por %p1180_p12, %p1179_p9 }
  0x74   : > { %p1182_p13 = pnand %p1181_p1, %p1175_p2 }
  0x76   : > { %1185 = shalt.err (!%p1182_p13)
}
  0x77   : > { %s1186_s15 = scalar_lea.vmem %s1540_s9, 2048  ;;  %s1318_s10 = smov [#allocation5]  }
  0x78   : > { %p1187_p6 = scmp.ne.s32.totalorder %s1540_s9, %s1186_s15  ;;  %s1191_s28 = sshll.u32 %s1318_s10, 4  ;;  %s1192_s28 = int_to_ptr.vmem [resolvable:$false] %s1191_s28 }
  0x79   : > { %s1193_s0 = scalar_lea.vmem %s1192_s28, 4096  ;;  %p1194_p5 = scmp.lt.s32.totalorder %s1540_s9, %s1192_s28 }
  0x7a   : > { %p1189_p10 = pnand %p1187_p6, %p1143_p0  ;;  %p1195_p3 = scmp.lt.s32.totalorder %s1193_s0, %s1186_s15 }
  0x7c   : > { %p1190_p4 = pneg %p1189_p10  ;;  %p1196_p7 = por %p1195_p3, %p1194_p5 }
  0x7e   : > { %p1197_p9 = pnand %p1196_p7, %p1190_p4 }
  0x80   : > { %1200 = shalt.err (!%p1197_p9)
}
  0x81   : > { %1032 = dma.hbm_to_vmem [thread:$0]  (!%p1497_p11), %s1504_s17, 2048, %s1540_s9, %s1543_s14, %s1762_s11, %s1762_s11, %s1761_s8  }
  0x82   : > { %263 = sbr.rel (%p1394_p8) target bundleno = 505 (0x1f9), region = 36  ;;  %s1575_s13 = sand.u32 (!%p1394_p8), 1, %s1303_s19  }
  0x83   : > { %s1578_s6 = sshll.u32 (!%p1394_p8), %s1575_s13, 7  ;;  %s266_s12 = scalar_lea.sflag (!%p1394_p8), [#allocation3], %s1575_s13 }
  0x84   : > { %s1582_s30 = scalar_lea.vmem (!%p1394_p8), [#allocation2], %s1578_s6  ;;  %p1763_p0 = scmp.ne.s32.totalorder (!%p1394_p8), %s1752_s24, 0 }
  0x89   : > { %1274 = dma.done.wait (%p1763_p0), %s266_s12, 2048  }
  0x8a   : > { %1276 = vsyncadd (%p1763_p0), %s266_s12, 4294965248  ;;  %s274_s26 = sand.u32 1, %s1375_s22   ;;  %s1590_s9 = scalar_lea.vmem [#allocation5], %s1578_s6 }
  0x8b   : > { %s275_s17 = scalar_lea.sflag [#allocation6], %s274_s26 }
  0x8c   : > { %1278 = dma.done.wait (%p1763_p0), %s275_s17, 2048  }
  0x8d   : > { %1280 = vsyncadd (%p1763_p0), %s275_s17, 4294965248  ;;  %p1764_p8 = scmp.eq.s32.totalorder %s1375_s22, 0 }
  0x8f   : > { %1282 = dma.done.wait (%p1764_p8), [#allocation6], 8192   ;;  %p1765_p11 = pmov %p1764_p8 }
  0x90   : > { %p1766_p2 = pmov %p1764_p8 }
  0x91   : > { %1284 = vsyncadd (%p1765_p11), [#allocation6], 4294959104 }
  0x92   : > { %1286 = dma.done.wait (%p1766_p2), [#allocation9], 8192   ;;  %p1767_p12 = pmov %p1766_p2 }
  0x93   : > { %v468_v0 = vld [vmem:[#allocation8 + $0x8] sm:$0xff]  ;;  %v470_v1 = vld [vmem:[#allocation8 + $0x18] sm:$0xff]  ;;  %v467_v5 = vld [vmem:[#allocation8] sm:$0xff]  ;;  %s1637_s24 = scalar_lea.vmem [#allocation10], %s1578_s6  ;;  %s985_s8 = sshll.u32 %s1375_s22, 11 }
  0x94   : > { %1288 = vsyncadd (%p1767_p12), [#allocation9], 4294959104  ;;  %v364_v2 = vld [vmem:[#allocation7 + $0x8] sm:$0xff]  ;;  %v532_v3 = vpack.c.bf16 %v470_v1, %v468_v0  ;;  %v366_v4 = vld [vmem:[#allocation7 + $0x18] sm:$0xff]  ;;  %s796_s11 = sshll.u32 %s1637_s24, 4  ;;  %s1657_s16 = scalar_lea.hbm %s1741_s4, %s985_s8  ;;  %s1659_s11 = int_to_ptr.vmem [resolvable:$true] %s796_s11 }
  0x95   : > { %v469_v6 = vld [vmem:[#allocation8 + $0x10] sm:$0xff]  ;;  %v428_v7 = vpack.c.bf16 %v366_v4, %v364_v2  ;;  %v363_v9 = vld [vmem:[#allocation7] sm:$0xff]  ;;  %v472_v11 = vld [vmem:[#allocation8 + $0x28] sm:$0xff]  ;;  %s778_s7 = scalar_lea.sflag [#allocation4], %s1575_s13  ;;  %s1201_s15 = scalar_lea.vmem %s1659_s11, 2048 }
  0x96   : > { %v531_v8 = vpack.c.bf16 %v469_v6, %v467_v5  ;;  %v365_v10 = vld [vmem:[#allocation7 + $0x10] sm:$0xff]  ;;  %563 = vmatprep.subr.bf16.mxu1 %v532_v3  ;;  %v474_v13 = vld [vmem:[#allocation8 + $0x38] sm:$0xff]  ;;  %v368_v14 = vld [vmem:[#allocation7 + $0x28] sm:$0xff]  ;;  %p1202_p1 = scmp.ne.s32.totalorder %s1659_s11, %s1201_s15  ;;  %p1768_p13 = scmp.ne.s32.totalorder %s1758_s23, 0 }
  0x97   : > { %v427_v12 = vpack.c.bf16 %v365_v10, %v363_v9  ;;  %v370_v15 = vld [vmem:[#allocation7 + $0x38] sm:$0xff]  ;;  %636 = vmatprep.subr.bf16.mxu0 %v428_v7  ;;  %v534_v16 = vpack.c.bf16 %v474_v13, %v472_v11  ;;  %v471_v18 = vld [vmem:[#allocation8 + $0x20] sm:$0xff]  ;;  %v473_v19 = vld [vmem:[#allocation8 + $0x30] sm:$0xff]  ;;  %s1319_s10 = smov [#allocation10]  }
  0x98   : > { %564 = vmatpush1.bf16.msra.mxu1 %v531_v8  ;;  %v430_v17 = vpack.c.bf16 %v370_v15, %v368_v14  ;;  %v367_v20 = vld [vmem:[#allocation7 + $0x20] sm:$0xff]  ;;  %v533_v21 = vpack.c.bf16 %v473_v19, %v471_v18  ;;  %v369_v22 = vld [vmem:[#allocation7 + $0x30] sm:$0xff]  ;;  %v476_v23 = vld [vmem:[#allocation8 + $0x48] sm:$0xff]  ;;  %p1203_p6 = pnand %p1202_p1, %p1768_p13  ;;  %s1205_s28 = sshll.u32 %s1319_s10, 4  ;;  %s1206_s28 = int_to_ptr.vmem [resolvable:$false] %s1205_s28 }
  0x99   : > { %637 = vmatpush1.bf16.msra.mxu0 %v427_v12  ;;  %v478_v24 = vld [vmem:[#allocation8 + $0x58] sm:$0xff]  ;;  %565 = vmatprep.subr.bf16.mxu1 %v534_v16  ;;  %v429_v25 = vpack.c.bf16 %v369_v22, %v367_v20  ;;  %v372_v27 = vld [vmem:[#allocation7 + $0x48] sm:$0xff]  ;;  %v475_v29 = vld [vmem:[#allocation8 + $0x40] sm:$0xff]  ;;  %s1207_s0 = scalar_lea.vmem %s1206_s28, 4096  ;;  %p1208_p4 = scmp.lt.s32.totalorder %s1659_s11, %s1206_s28 }
  0x9a   : > { %638 = vmatprep.subr.bf16.mxu0 %v430_v17  ;;  %v536_v26 = vpack.c.bf16 %v478_v24, %v476_v23  ;;  %v374_v28 = vld [vmem:[#allocation7 + $0x58] sm:$0xff]  ;;  %v477_v31 = vld [vmem:[#allocation8 + $0x50] sm:$0xff]  ;;  %v371_v32 = vld [vmem:[#allocation7 + $0x40] sm:$0xff]  ;;  %p1204_p10 = pneg %p1203_p6  ;;  %p1209_p5 = scmp.lt.s32.totalorder %s1207_s0, %s1201_s15 }
  0x9b   : > { %v432_v30 = vpack.c.bf16 %v374_v28, %v372_v27  ;;  %v373_v33 = vld [vmem:[#allocation7 + $0x50] sm:$0xff]  ;;  %v535_v34 = vpack.c.bf16 %v477_v31, %v475_v29  ;;  %v480_v35 = vld [vmem:[#allocation8 + $0x68] sm:$0xff]  ;;  %v482_v36 = vld [vmem:[#allocation8 + $0x78] sm:$0xff] }
  0x9c   : > { %566 = vmatpush1.bf16.msra.mxu1 %v533_v21  ;;  %v376_v37 = vld [vmem:[#allocation7 + $0x68] sm:$0xff]  ;;  %v431_v38 = vpack.c.bf16 %v373_v33, %v371_v32  ;;  %v538_v39 = vpack.c.bf16 %v482_v36, %v480_v35  ;;  %v378_v40 = vld [vmem:[#allocation7 + $0x78] sm:$0xff]  ;;  %v479_v41 = vld [vmem:[#allocation8 + $0x60] sm:$0xff]  ;;  %p1210_p3 = por %p1209_p5, %p1208_p4 }
  0x9d   : > { %639 = vmatpush1.bf16.msra.mxu0 %v429_v25  ;;  %567 = vmatprep.subr.bf16.mxu1 %v536_v26  ;;  %v481_v42 = vld [vmem:[#allocation8 + $0x70] sm:$0xff]  ;;  %v434_v43 = vpack.c.bf16 %v378_v40, %v376_v37  ;;  %v375_v44 = vld [vmem:[#allocation7 + $0x60] sm:$0xff]  ;;  %v484_v46 = vld [vmem:[#allocation8 + $0x88] sm:$0xff] }
  0x9e   : > { %640 = vmatprep.subr.bf16.mxu0 %v432_v30  ;;  %v377_v45 = vld [vmem:[#allocation7 + $0x70] sm:$0xff]  ;;  %v486_v47 = vld [vmem:[#allocation8 + $0x98] sm:$0xff]  ;;  %v380_v48 = vld [vmem:[#allocation7 + $0x88] sm:$0xff]  ;;  %v537_v50 = vpack.c.bf16 %v481_v42, %v479_v41  ;;  %p1211_p7 = pnand %p1210_p3, %p1204_p10 }
  0x9f   : > { %v382_v49 = vld [vmem:[#allocation7 + $0x98] sm:$0xff]  ;;  %v433_v51 = vpack.c.bf16 %v377_v45, %v375_v44  ;;  %v540_v52 = vpack.c.bf16 %v486_v47, %v484_v46  ;;  %v483_v53 = vld [vmem:[#allocation8 + $0x80] sm:$0xff]  ;;  %v485_v54 = vld [vmem:[#allocation8 + $0x90] sm:$0xff] }
  0xa0   : > { %568 = vmatpush1.bf16.msra.mxu1 %v535_v34  ;;  %v379_v55 = vld [vmem:[#allocation7 + $0x80] sm:$0xff]  ;;  %v436_v56 = vpack.c.bf16 %v382_v49, %v380_v48  ;;  %v381_v57 = vld [vmem:[#allocation7 + $0x90] sm:$0xff]  ;;  %v488_v58 = vld [vmem:[#allocation8 + $0xa8] sm:$0xff]  ;;  %v539_v62 = vpack.c.bf16 %v485_v54, %v483_v53 }
  0xa1   : > { %641 = vmatpush1.bf16.msra.mxu0 %v431_v38  ;;  %569 = vmatprep.subr.bf16.mxu1 %v538_v39  ;;  %v490_v59 = vld [vmem:[#allocation8 + $0xb8] sm:$0xff]  ;;  %v384_v60 = vld [vmem:[#allocation7 + $0xa8] sm:$0xff]  ;;  %v435_v63 = vpack.c.bf16 %v381_v57, %v379_v55  ;;  %v487_v1 = vld [vmem:[#allocation8 + $0xa0] sm:$0xff] }
  0xa2   : > { %642 = vmatprep.subr.bf16.mxu0 %v434_v43  ;;  %v386_v61 = vld [vmem:[#allocation7 + $0xb8] sm:$0xff]  ;;  %v542_v0 = vpack.c.bf16 %v490_v59, %v488_v58  ;;  %v489_v2 = vld [vmem:[#allocation8 + $0xb0] sm:$0xff]  ;;  %v383_v3 = vld [vmem:[#allocation7 + $0xa0] sm:$0xff] }
  0xa3   : > { %v438_v4 = vpack.c.bf16 %v386_v61, %v384_v60  ;;  %v385_v5 = vld [vmem:[#allocation7 + $0xb0] sm:$0xff]  ;;  %v492_v6 = vld [vmem:[#allocation8 + $0xc8] sm:$0xff]  ;;  %v494_v7 = vld [vmem:[#allocation8 + $0xd8] sm:$0xff]  ;;  %v541_v10 = vpack.c.bf16 %v489_v2, %v487_v1 }
  0xa4   : > { %570 = vmatpush1.bf16.msra.mxu1 %v537_v50  ;;  %v388_v8 = vld [vmem:[#allocation7 + $0xc8] sm:$0xff]  ;;  %v390_v9 = vld [vmem:[#allocation7 + $0xd8] sm:$0xff]  ;;  %v437_v11 = vpack.c.bf16 %v385_v5, %v383_v3  ;;  %v544_v12 = vpack.c.bf16 %v494_v7, %v492_v6  ;;  %v491_v13 = vld [vmem:[#allocation8 + $0xc0] sm:$0xff] }
  0xa5   : > { %643 = vmatpush1.bf16.msra.mxu0 %v433_v51  ;;  %571 = vmatprep.subr.bf16.mxu1 %v540_v52  ;;  %v493_v14 = vld [vmem:[#allocation8 + $0xd0] sm:$0xff]  ;;  %v387_v15 = vld [vmem:[#allocation7 + $0xc0] sm:$0xff]  ;;  %v440_v16 = vpack.c.bf16 %v390_v9, %v388_v8  ;;  %v496_v18 = vld [vmem:[#allocation8 + $0xe8] sm:$0xff] }
  0xa6   : > { %644 = vmatprep.subr.bf16.mxu0 %v436_v56  ;;  %v389_v17 = vld [vmem:[#allocation7 + $0xd0] sm:$0xff]  ;;  %v498_v19 = vld [vmem:[#allocation8 + $0xf8] sm:$0xff]  ;;  %v392_v20 = vld [vmem:[#allocation7 + $0xe8] sm:$0xff]  ;;  %v543_v22 = vpack.c.bf16 %v493_v14, %v491_v13 }
  0xa7   : > { %v394_v21 = vld [vmem:[#allocation7 + $0xf8] sm:$0xff]  ;;  %v439_v23 = vpack.c.bf16 %v389_v17, %v387_v15  ;;  %v546_v24 = vpack.c.bf16 %v498_v19, %v496_v18  ;;  %v495_v25 = vld [vmem:[#allocation8 + $0xe0] sm:$0xff]  ;;  %v497_v26 = vld [vmem:[#allocation8 + $0xf0] sm:$0xff] }
  0xa8   : > { %572 = vmatpush1.bf16.msra.mxu1 %v539_v62  ;;  %v391_v27 = vld [vmem:[#allocation7 + $0xe0] sm:$0xff]  ;;  %v442_v28 = vpack.c.bf16 %v394_v21, %v392_v20  ;;  %v393_v29 = vld [vmem:[#allocation7 + $0xf0] sm:$0xff]  ;;  %v500_v30 = vld [vmem:[#allocation8 + $0x108] sm:$0xff]  ;;  %v545_v34 = vpack.c.bf16 %v497_v26, %v495_v25 }
  0xa9   : > { %645 = vmatpush1.bf16.msra.mxu0 %v435_v63  ;;  %573 = vmatprep.subr.bf16.mxu1 %v542_v0  ;;  %v502_v31 = vld [vmem:[#allocation8 + $0x118] sm:$0xff]  ;;  %v396_v32 = vld [vmem:[#allocation7 + $0x108] sm:$0xff]  ;;  %v441_v35 = vpack.c.bf16 %v393_v29, %v391_v27  ;;  %v499_v37 = vld [vmem:[#allocation8 + $0x100] sm:$0xff] }
  0xaa   : > { %646 = vmatprep.subr.bf16.mxu0 %v438_v4  ;;  %v398_v33 = vld [vmem:[#allocation7 + $0x118] sm:$0xff]  ;;  %v548_v36 = vpack.c.bf16 %v502_v31, %v500_v30  ;;  %v501_v38 = vld [vmem:[#allocation8 + $0x110] sm:$0xff]  ;;  %v395_v39 = vld [vmem:[#allocation7 + $0x100] sm:$0xff] }
  0xab   : > { %v444_v40 = vpack.c.bf16 %v398_v33, %v396_v32  ;;  %v397_v41 = vld [vmem:[#allocation7 + $0x110] sm:$0xff]  ;;  %v504_v42 = vld [vmem:[#allocation8 + $0x128] sm:$0xff]  ;;  %v506_v43 = vld [vmem:[#allocation8 + $0x138] sm:$0xff]  ;;  %v547_v46 = vpack.c.bf16 %v501_v38, %v499_v37 }
  0xac   : > { %574 = vmatpush1.bf16.msra.mxu1 %v541_v10  ;;  %v400_v44 = vld [vmem:[#allocation7 + $0x128] sm:$0xff]  ;;  %v402_v45 = vld [vmem:[#allocation7 + $0x138] sm:$0xff]  ;;  %v443_v47 = vpack.c.bf16 %v397_v41, %v395_v39  ;;  %v550_v48 = vpack.c.bf16 %v506_v43, %v504_v42  ;;  %v503_v49 = vld [vmem:[#allocation8 + $0x120] sm:$0xff] }
  0xad   : > { %647 = vmatpush1.bf16.msra.mxu0 %v437_v11  ;;  %575 = vmatprep.subr.bf16.mxu1 %v544_v12  ;;  %v505_v50 = vld [vmem:[#allocation8 + $0x130] sm:$0xff]  ;;  %v399_v51 = vld [vmem:[#allocation7 + $0x120] sm:$0xff]  ;;  %v446_v52 = vpack.c.bf16 %v402_v45, %v400_v44  ;;  %v508_v54 = vld [vmem:[#allocation8 + $0x148] sm:$0xff] }
  0xae   : > { %648 = vmatprep.subr.bf16.mxu0 %v440_v16  ;;  %v401_v53 = vld [vmem:[#allocation7 + $0x130] sm:$0xff]  ;;  %v510_v55 = vld [vmem:[#allocation8 + $0x158] sm:$0xff]  ;;  %v404_v56 = vld [vmem:[#allocation7 + $0x148] sm:$0xff]  ;;  %v549_v58 = vpack.c.bf16 %v505_v50, %v503_v49 }
  0xaf   : > { %v406_v57 = vld [vmem:[#allocation7 + $0x158] sm:$0xff]  ;;  %v445_v59 = vpack.c.bf16 %v401_v53, %v399_v51  ;;  %v552_v60 = vpack.c.bf16 %v510_v55, %v508_v54  ;;  %v507_v61 = vld [vmem:[#allocation8 + $0x140] sm:$0xff]  ;;  %v509_v62 = vld [vmem:[#allocation8 + $0x150] sm:$0xff] }
  0xb0   : > { %576 = vmatpush1.bf16.msra.mxu1 %v543_v22  ;;  %v403_v63 = vld [vmem:[#allocation7 + $0x140] sm:$0xff]  ;;  %v448_v0 = vpack.c.bf16 %v406_v57, %v404_v56  ;;  %v405_v1 = vld [vmem:[#allocation7 + $0x150] sm:$0xff]  ;;  %v512_v2 = vld [vmem:[#allocation8 + $0x168] sm:$0xff]  ;;  %v551_v6 = vpack.c.bf16 %v509_v62, %v507_v61 }
  0xb1   : > { %649 = vmatpush1.bf16.msra.mxu0 %v439_v23  ;;  %577 = vmatprep.subr.bf16.mxu1 %v546_v24  ;;  %v514_v3 = vld [vmem:[#allocation8 + $0x178] sm:$0xff]  ;;  %v408_v4 = vld [vmem:[#allocation7 + $0x168] sm:$0xff]  ;;  %v511_v7 = vld [vmem:[#allocation8 + $0x160] sm:$0xff]  ;;  %v447_v10 = vpack.c.bf16 %v405_v1, %v403_v63 }
  0xb2   : > { %650 = vmatprep.subr.bf16.mxu0 %v442_v28  ;;  %v410_v5 = vld [vmem:[#allocation7 + $0x178] sm:$0xff]  ;;  %v513_v8 = vld [vmem:[#allocation8 + $0x170] sm:$0xff]  ;;  %v407_v9 = vld [vmem:[#allocation7 + $0x160] sm:$0xff]  ;;  %v554_v11 = vpack.c.bf16 %v514_v3, %v512_v2 }
  0xb3   : > { %v409_v12 = vld [vmem:[#allocation7 + $0x170] sm:$0xff]  ;;  %v516_v13 = vld [vmem:[#allocation8 + $0x188] sm:$0xff]  ;;  %v518_v14 = vld [vmem:[#allocation8 + $0x198] sm:$0xff]  ;;  %v450_v15 = vpack.c.bf16 %v410_v5, %v408_v4  ;;  %v553_v22 = vpack.c.bf16 %v513_v8, %v511_v7 }
  0xb4   : > { %578 = vmatpush1.bf16.msra.mxu1 %v545_v34  ;;  %v412_v16 = vld [vmem:[#allocation7 + $0x188] sm:$0xff]  ;;  %v414_v17 = vld [vmem:[#allocation7 + $0x198] sm:$0xff]  ;;  %v449_v25 = vpack.c.bf16 %v409_v12, %v407_v9  ;;  %v556_v26 = vpack.c.bf16 %v518_v14, %v516_v13  ;;  %v515_v27 = vld [vmem:[#allocation8 + $0x180] sm:$0xff] }
  0xb5   : > { %651 = vmatpush1.bf16.msra.mxu0 %v441_v35  ;;  %579 = vmatprep.subr.bf16.mxu1 %v548_v36  ;;  %v340_v18 = vld [vmem:[%s1590_s9 + $0x8] sm:$0xff]  ;;  %v342_v19 = vld [vmem:[%s1590_s9 + $0x18] sm:$0xff]  ;;  %v517_v28 = vld [vmem:[#allocation8 + $0x190] sm:$0xff]  ;;  %v452_v30 = vpack.c.bf16 %v414_v17, %v412_v16 }
  0xb6   : > { %652 = vmatprep.subr.bf16.mxu0 %v444_v40  ;;  %v324_v20 = vld [vmem:[%s1582_s30 + $0x8] sm:$0xff]  ;;  %v326_v21 = vld [vmem:[%s1582_s30 + $0x18] sm:$0xff]  ;;  %v460_v23 = vpack.c.bf16 %v342_v19, %v340_v18  ;;  %v411_v29 = vld [vmem:[#allocation7 + $0x180] sm:$0xff]  ;;  %v555_v36 = vpack.c.bf16 %v517_v28, %v515_v27 }
  0xb7   : > { %v356_v24 = vpack.c.bf16 %v326_v21, %v324_v20  ;;  %v413_v31 = vld [vmem:[#allocation7 + $0x190] sm:$0xff]  ;;  %v520_v32 = vld [vmem:[#allocation8 + $0x1a8] sm:$0xff]  ;;  %v522_v33 = vld [vmem:[#allocation8 + $0x1b8] sm:$0xff] }
  0xb8   : > { %580 = vmatpush1.bf16.msra.mxu1 %v547_v46  ;;  %595 = vmatprep.mubr.bf16.mxu1 %v460_v23  ;;  %v416_v34 = vld [vmem:[#allocation7 + $0x1a8] sm:$0xff]  ;;  %v418_v35 = vld [vmem:[#allocation7 + $0x1b8] sm:$0xff]  ;;  %v451_v37 = vpack.c.bf16 %v413_v31, %v411_v29  ;;  %v558_v38 = vpack.c.bf16 %v522_v33, %v520_v32  ;;  %v519_v39 = vld [vmem:[#allocation8 + $0x1a0] sm:$0xff] }
  0xb9   : > { %653 = vmatpush1.bf16.msra.mxu0 %v443_v47  ;;  %581 = vmatprep.subr.bf16.mxu1 %v550_v48  ;;  %v521_v40 = vld [vmem:[#allocation8 + $0x1b0] sm:$0xff]  ;;  %v415_v41 = vld [vmem:[#allocation7 + $0x1a0] sm:$0xff]  ;;  %v454_v42 = vpack.c.bf16 %v418_v35, %v416_v34  ;;  %v524_v44 = vld [vmem:[#allocation8 + $0x1c8] sm:$0xff] }
  0xba   : > { %654 = vmatprep.subr.bf16.mxu0 %v446_v52  ;;  %668 = vmatprep.mubr.bf16.mxu0 %v356_v24  ;;  %v417_v43 = vld [vmem:[#allocation7 + $0x1b0] sm:$0xff]  ;;  %v526_v45 = vld [vmem:[#allocation8 + $0x1d8] sm:$0xff]  ;;  %v420_v46 = vld [vmem:[#allocation7 + $0x1c8] sm:$0xff]  ;;  %v557_v48 = vpack.c.bf16 %v521_v40, %v519_v39 }
  0xbb   : > { %v422_v47 = vld [vmem:[#allocation7 + $0x1d8] sm:$0xff]  ;;  %v453_v49 = vpack.c.bf16 %v417_v43, %v415_v41  ;;  %v560_v50 = vpack.c.bf16 %v526_v45, %v524_v44  ;;  %v523_v51 = vld [vmem:[#allocation8 + $0x1c0] sm:$0xff]  ;;  %v525_v52 = vld [vmem:[#allocation8 + $0x1d0] sm:$0xff] }
  0xbc   : > { %582 = vmatpush1.bf16.msra.mxu1 %v549_v58  ;;  %v419_v53 = vld [vmem:[#allocation7 + $0x1c0] sm:$0xff]  ;;  %v456_v54 = vpack.c.bf16 %v422_v47, %v420_v46  ;;  %v421_v55 = vld [vmem:[#allocation7 + $0x1d0] sm:$0xff]  ;;  %v528_v56 = vld [vmem:[#allocation8 + $0x1e8] sm:$0xff] }
  0xbd   : > { %655 = vmatpush1.bf16.msra.mxu0 %v445_v59  ;;  %583 = vmatprep.subr.bf16.mxu1 %v552_v60  ;;  %v530_v57 = vld [vmem:[#allocation8 + $0x1f8] sm:$0xff]  ;;  %v424_v58 = vld [vmem:[#allocation7 + $0x1e8] sm:$0xff]  ;;  %v559_v60 = vpack.c.bf16 %v525_v52, %v523_v51  ;;  %v455_v61 = vpack.c.bf16 %v421_v55, %v419_v53  ;;  %v527_v63 = vld [vmem:[#allocation8 + $0x1e0] sm:$0xff] }
  0xbe   : > { %656 = vmatprep.subr.bf16.mxu0 %v448_v0  ;;  %v426_v59 = vld [vmem:[#allocation7 + $0x1f8] sm:$0xff]  ;;  %v562_v62 = vpack.c.bf16 %v530_v57, %v528_v56  ;;  %v529_v0 = vld [vmem:[#allocation8 + $0x1f0] sm:$0xff]  ;;  %v423_v2 = vld [vmem:[#allocation7 + $0x1e0] sm:$0xff] }
  0xbf   : > { %v458_v1 = vpack.c.bf16 %v426_v59, %v424_v58  ;;  %v425_v3 = vld [vmem:[#allocation7 + $0x1f0] sm:$0xff]  ;;  %v561_v4 = vpack.c.bf16 %v529_v0, %v527_v63  ;;  %v339_v5 = vld [vmem:[%s1590_s9] sm:$0xff]  ;;  %v328_v12 = vld [vmem:[%s1582_s30 + $0x28] sm:$0xff] }
  0xc0   : > { %584 = vmatpush1.bf16.msra.mxu1 %v551_v6  ;;  %v341_v6 = vld [vmem:[%s1590_s9 + $0x10] sm:$0xff]  ;;  %v323_v7 = vld [vmem:[%s1582_s30] sm:$0xff]  ;;  %v457_v8 = vpack.c.bf16 %v425_v3, %v423_v2  ;;  %v330_v13 = vld [vmem:[%s1582_s30 + $0x38] sm:$0xff] }
  0xc1   : > { %657 = vmatpush1.bf16.msra.mxu0 %v447_v10  ;;  %585 = vmatprep.subr.bf16.mxu1 %v554_v11  ;;  %v325_v9 = vld [vmem:[%s1582_s30 + $0x10] sm:$0xff]  ;;  %v344_v10 = vld [vmem:[%s1590_s9 + $0x28] sm:$0xff]  ;;  %v346_v11 = vld [vmem:[%s1590_s9 + $0x38] sm:$0xff]  ;;  %v459_v14 = vpack.c.bf16 %v341_v6, %v339_v5  ;;  %v358_v17 = vpack.c.bf16 %v330_v13, %v328_v12 }
  0xc2   : > { %658 = vmatprep.subr.bf16.mxu0 %v450_v15  ;;  %v355_v15 = vpack.c.bf16 %v325_v9, %v323_v7  ;;  %v462_v16 = vpack.c.bf16 %v346_v11, %v344_v10  ;;  %v343_v18 = vld [vmem:[%s1590_s9 + $0x20] sm:$0xff]  ;;  %v345_v19 = vld [vmem:[%s1590_s9 + $0x30] sm:$0xff]  ;;  %v350_v23 = vld [vmem:[%s1590_s9 + $0x58] sm:$0xff] }
  0xc3   : > { %v327_v20 = vld [vmem:[%s1582_s30 + $0x20] sm:$0xff]  ;;  %v329_v21 = vld [vmem:[%s1582_s30 + $0x30] sm:$0xff]  ;;  %v332_v24 = vld [vmem:[%s1582_s30 + $0x48] sm:$0xff] }
  0xc4   : > { %586 = vmatpush1.bf16.msra.mxu1 %v553_v22  ;;  %v348_v22 = vld [vmem:[%s1590_s9 + $0x48] sm:$0xff]  ;;  %v357_v27 = vpack.c.bf16 %v329_v21, %v327_v20  ;;  %v349_v31 = vld [vmem:[%s1590_s9 + $0x50] sm:$0xff]  ;;  %v331_v32 = vld [vmem:[%s1582_s30 + $0x40] sm:$0xff] }
  0xc5   : > { %659 = vmatpush1.bf16.msra.mxu0 %v449_v25  ;;  %587 = vmatprep.subr.bf16.mxu1 %v556_v26  ;;  %v334_v25 = vld [vmem:[%s1582_s30 + $0x58] sm:$0xff]  ;;  %v461_v26 = vpack.c.bf16 %v345_v19, %v343_v18  ;;  %v464_v28 = vpack.c.bf16 %v350_v23, %v348_v22  ;;  %v333_v33 = vld [vmem:[%s1582_s30 + $0x50] sm:$0xff]  ;;  %v352_v34 = vld [vmem:[%s1590_s9 + $0x68] sm:$0xff] }
  0xc6   : > { %660 = vmatprep.subr.bf16.mxu0 %v452_v30  ;;  %v360_v29 = vpack.c.bf16 %v334_v25, %v332_v24  ;;  %v347_v30 = vld [vmem:[%s1590_s9 + $0x40] sm:$0xff]  ;;  %v354_v35 = vld [vmem:[%s1590_s9 + $0x78] sm:$0xff]  ;;  %v359_v39 = vpack.c.bf16 %v333_v33, %v331_v32  ;;  %v353_v43 = vld [vmem:[%s1590_s9 + $0x70] sm:$0xff] }
  0xc7   : > { %v466_v40 = vpack.c.bf16 %v354_v35, %v352_v34  ;;  %v335_v44 = vld [vmem:[%s1582_s30 + $0x60] sm:$0xff]  ;;  %v337_v45 = vld [vmem:[%s1582_s30 + $0x70] sm:$0xff] }
  0xc8   : > { %588 = vmatpush1.bf16.msra.mxu1 %v555_v36  ;;  %v336_v36 = vld [vmem:[%s1582_s30 + $0x68] sm:$0xff]  ;;  %v361_v47 = vpack.c.bf16 %v337_v45, %v335_v44 }
  0xc9   : > { %661 = vmatpush1.bf16.msra.mxu0 %v451_v37  ;;  %589 = vmatprep.subr.bf16.mxu1 %v558_v38  ;;  %v338_v37 = vld [vmem:[%s1582_s30 + $0x78] sm:$0xff]  ;;  %v463_v38 = vpack.c.bf16 %v349_v31, %v347_v30 }
  0xca   : > { %662 = vmatprep.subr.bf16.mxu0 %v454_v42  ;;  %v362_v41 = vpack.c.bf16 %v338_v37, %v336_v36  ;;  %v351_v42 = vld [vmem:[%s1590_s9 + $0x60] sm:$0xff] }
  0xcb   : > { %v465_v46 = vpack.c.bf16 %v353_v43, %v351_v42 }
  0xcc   : > { %590 = vmatpush1.bf16.msra.mxu1 %v557_v48 }
  0xcd   : > { %663 = vmatpush1.bf16.msra.mxu0 %v453_v49  ;;  %591 = vmatprep.subr.bf16.mxu1 %v560_v50 }
  0xce   : > { %664 = vmatprep.subr.bf16.mxu0 %v456_v54 }
  0xd0   : > { %592 = vmatpush1.bf16.msra.mxu1 %v559_v60 }
  0xd1   : > { %665 = vmatpush1.bf16.msra.mxu0 %v455_v61  ;;  %593 = vmatprep.subr.bf16.mxu1 %v562_v62 }
  0xd2   : > { %666 = vmatprep.subr.bf16.mxu0 %v458_v1 }
  0xd4   : > { %594 = vmatpush1.bf16.msra.mxu1 %v561_v4 }
  0xd5   : > { %667 = vmatpush1.bf16.msra.mxu0 %v457_v8 }
  0xd7   : > { %596 = vmatmul.mubr.bf16.vlgmr.msra.gmra.mrb[0].mxu1 %v459_v14 }
  0xd8   : > { %669 = vmatmul.mubr.bf16.vlgmr.msra.gmra.mrb[0].mxu0 %v355_v15  ;;  %605 = vmatprep.mubr.bf16.mxu1 %v462_v16 }
  0xd9   : > { %678 = vmatprep.mubr.bf16.mxu0 %v358_v17 }
  0xdf   : > { %606 = vmatmul.mubr.bf16.gmra.mrb[4].mxu1 %v461_v26 }
  0xe0   : > { %679 = vmatmul.mubr.bf16.gmra.mrb[4].mxu0 %v357_v27  ;;  %615 = vmatprep.mubr.bf16.mxu1 %v464_v28 }
  0xe1   : > { %688 = vmatprep.mubr.bf16.mxu0 %v360_v29 }
  0xe7   : > { %616 = vmatmul.mubr.bf16.gmra.mrb[8].mxu1 %v463_v38 }
  0xe8   : > { %689 = vmatmul.mubr.bf16.gmra.mrb[8].mxu0 %v359_v39  ;;  %625 = vmatprep.mubr.bf16.mxu1 %v466_v40 }
  0xe9   : > { %698 = vmatprep.mubr.bf16.mxu0 %v362_v41 }
  0xef   : > { %626 = vmatmul.mubr.bf16.gmra.mrb[12].mxu1 %v465_v46 }
  0xf0   : > { %699 = vmatmul.mubr.bf16.gmra.mrb[12].mxu0 %v361_v47 }
 0x1aa   : > { %v597_v48 = vpop.f32.mrb[0].mxu1 }
 0x1ab   : > { %v670_v49 = vpop.f32.mrb[0].mxu0  ;;  %v599_v50 = vpop.f32.mrb[1].mxu1 }
 0x1ac   : > { %v671_v51 = vadd.f32 %v670_v49, %v597_v48  ;;  %v672_v52 = vpop.f32.mrb[1].mxu0  ;;  %v601_v53 = vpop.f32.mrb[2].mxu1 }
 0x1ad   : > { %v673_v54 = vadd.f32 %v672_v52, %v599_v50  ;;  %v674_v55 = vpop.f32.mrb[2].mxu0  ;;  %v603_v56 = vpop.f32.mrb[3].mxu1 }
 0x1ae   : > { %709 = vst [vmem:[%s1637_s24] sm:$0xff] %v671_v51  ;;  %v675_v57 = vadd.f32 %v674_v55, %v601_v53  ;;  %v676_v58 = vpop.f32.mrb[3].mxu0 }
 0x1af   : > { %710 = vst [vmem:[%s1637_s24 + $0x8] sm:$0xff] %v673_v54  ;;  %v677_v59 = vadd.f32 %v676_v58, %v603_v56 }
 0x1b0   : > { %711 = vst [vmem:[%s1637_s24 + $0x10] sm:$0xff] %v675_v57  ;;  %v725_v60 = vadd.f32 %v675_v57, %v671_v51 }
 0x1b1   : > { %712 = vst [vmem:[%s1637_s24 + $0x18] sm:$0xff] %v677_v59  ;;  %v738_v61 = vadd.f32 %v677_v59, %v673_v54 }
 0x1b2   : > { %v607_v62 = vpop.f32.mrb[4].mxu1 }
 0x1b3   : > { %v680_v63 = vpop.f32.mrb[4].mxu0  ;;  %v609_v0 = vpop.f32.mrb[5].mxu1 }
 0x1b4   : > { %v681_v1 = vadd.f32 %v680_v63, %v607_v62  ;;  %v682_v2 = vpop.f32.mrb[5].mxu0  ;;  %v611_v3 = vpop.f32.mrb[6].mxu1 }
 0x1b5   : > { %v683_v4 = vadd.f32 %v682_v2, %v609_v0  ;;  %v684_v5 = vpop.f32.mrb[6].mxu0  ;;  %v613_v6 = vpop.f32.mrb[7].mxu1 }
 0x1b6   : > { %713 = vst [vmem:[%s1637_s24 + $0x20] sm:$0xff] %v681_v1  ;;  %v726_v7 = vadd.f32 %v725_v60, %v681_v1  ;;  %v685_v8 = vadd.f32 %v684_v5, %v611_v3  ;;  %v686_v9 = vpop.f32.mrb[7].mxu0 }
 0x1b7   : > { %714 = vst [vmem:[%s1637_s24 + $0x28] sm:$0xff] %v683_v4  ;;  %v739_v10 = vadd.f32 %v738_v61, %v683_v4  ;;  %v687_v11 = vadd.f32 %v686_v9, %v613_v6 }
 0x1b8   : > { %715 = vst [vmem:[%s1637_s24 + $0x30] sm:$0xff] %v685_v8  ;;  %v727_v12 = vadd.f32 %v726_v7, %v685_v8 }
 0x1b9   : > { %716 = vst [vmem:[%s1637_s24 + $0x38] sm:$0xff] %v687_v11  ;;  %v740_v13 = vadd.f32 %v739_v10, %v687_v11 }
 0x1ba   : > { %v617_v14 = vpop.f32.mrb[8].mxu1 }
 0x1bb   : > { %v690_v15 = vpop.f32.mrb[8].mxu0  ;;  %v619_v16 = vpop.f32.mrb[9].mxu1 }
 0x1bc   : > { %v691_v17 = vadd.f32 %v690_v15, %v617_v14  ;;  %v692_v18 = vpop.f32.mrb[9].mxu0  ;;  %v621_v19 = vpop.f32.mrb[10].mxu1 }
 0x1bd   : > { %v693_v20 = vadd.f32 %v692_v18, %v619_v16  ;;  %v694_v21 = vpop.f32.mrb[10].mxu0  ;;  %v623_v22 = vpop.f32.mrb[11].mxu1 }
 0x1be   : > { %717 = vst [vmem:[%s1637_s24 + $0x40] sm:$0xff] %v691_v17  ;;  %v728_v23 = vadd.f32 %v727_v12, %v691_v17  ;;  %v695_v24 = vadd.f32 %v694_v21, %v621_v19  ;;  %v696_v25 = vpop.f32.mrb[11].mxu0 }
 0x1bf   : > { %718 = vst [vmem:[%s1637_s24 + $0x48] sm:$0xff] %v693_v20  ;;  %v741_v26 = vadd.f32 %v740_v13, %v693_v20  ;;  %v697_v27 = vadd.f32 %v696_v25, %v623_v22 }
 0x1c0   : > { %719 = vst [vmem:[%s1637_s24 + $0x50] sm:$0xff] %v695_v24  ;;  %v729_v28 = vadd.f32 %v728_v23, %v695_v24 }
 0x1c1   : > { %720 = vst [vmem:[%s1637_s24 + $0x58] sm:$0xff] %v697_v27  ;;  %v742_v29 = vadd.f32 %v741_v26, %v697_v27 }
 0x1c2   : > { %v627_v30 = vpop.f32.mrb[12].mxu1 }
 0x1c3   : > { %v700_v31 = vpop.f32.mrb[12].mxu0  ;;  %v629_v32 = vpop.f32.mrb[13].mxu1 }
 0x1c4   : > { %v701_v33 = vadd.f32 %v700_v31, %v627_v30  ;;  %v702_v34 = vpop.f32.mrb[13].mxu0  ;;  %v631_v35 = vpop.f32.mrb[14].mxu1 }
 0x1c5   : > { %v703_v36 = vadd.f32 %v702_v34, %v629_v32  ;;  %v704_v37 = vpop.f32.mrb[14].mxu0  ;;  %v633_v38 = vpop.f32.mrb[15].mxu1 }
 0x1c6   : > { %721 = vst [vmem:[%s1637_s24 + $0x60] sm:$0xff] %v701_v33  ;;  %v730_v39 = vadd.f32 %v729_v28, %v701_v33  ;;  %v705_v40 = vadd.f32 %v704_v37, %v631_v35  ;;  %v706_v41 = vpop.f32.mrb[15].mxu0 }
 0x1c7   : > { %722 = vst [vmem:[%s1637_s24 + $0x68] sm:$0xff] %v703_v36  ;;  %v743_v42 = vadd.f32 %v742_v29, %v703_v36  ;;  %v707_v43 = vadd.f32 %v706_v41, %v633_v38 }
 0x1c8   : > { %723 = vst [vmem:[%s1637_s24 + $0x70] sm:$0xff] %v705_v40  ;;  %v731_v44 = vadd.f32 %v730_v39, %v705_v40 }
 0x1c9   : > { %724 = vst [vmem:[%s1637_s24 + $0x78] sm:$0xff] %v707_v43  ;;  %v744_v45 = vadd.f32 %v743_v42, %v707_v43 }
 0x1ca   : > { %v732_v46 = vrot.slane %v731_v44, 4 }
 0x1cb   : > { %1214 = shalt.err (!%p1211_p7)
}
 0x1cc   : > { %s1215_s6 = scalar_lea.hbm %s1657_s16, 2048  ;;  %s1219_s26 = scalar_lea.hbm %s1741_s4, 4096 }
 0x1cd   : > { %p1216_p9 = scmp.ne.s32.totalorder %s1657_s16, %s1215_s6  ;;  %p1220_p11 = scmp.lt.u32.totalorder %s1657_s16, %s1741_s4 }
 0x1ce   : > { %p1221_p2 = scmp.lt.u32.totalorder %s1219_s26, %s1215_s6  ;;  %p1223_p1 = scmp.lt.u32.totalorder %s1215_s6, %s1657_s16 }
 0x1cf   : > { %p1217_p0 = pnand %p1216_p9, %p1768_p13 }
 0x1d0   : > { %p1222_p12 = por %p1221_p2, %p1220_p11 }
 0x1d1   : > { %p1218_p8 = pneg %p1217_p0 }
 0x1d2   : > { %p1224_p6 = por %p1223_p1, %p1222_p12 }
 0x1d4   : > { %p1225_p10 = pnand %p1224_p6, %p1218_p8 }
 0x1d6   : > { %1228 = shalt.err (!%p1225_p10)
}
 0x1d7   : > { %s1320_s24 = smov 256   ;;  %s1321_s8 = smov 16   ;;  %v745_v47 = vrot.slane %v744_v45, 4  ;;  %v733_v48 = vadd.f32 %v732_v46, %v731_v44  ;;  %v1322_v52 = vmov 1966171168   ;;  %v760_v54 = vlaneseq }
 0x1d8   : > { %1015 = dma.vmem_to_hbm [thread:$0]  (%p1768_p13), %s1659_s11, 2048, %s1657_s16, %s778_s7, %s1320_s24, %s1320_s24, %s1321_s8   ;;  %v758_v53 = vunpack.c.l.s4 %v1322_v52 }
 0x1d9   : > { %v746_v49 = vadd.f32 %v745_v47, %v744_v45  ;;  %v734_v50 = vrot.slane %v733_v48, 2  ;;  %v761_v60 = vshrl.u32 %v760_v54, 7  ;;  %s974_s14 = sshll.u32 %s1575_s13, 1  ;;  %s986_s11 = sshll.u32 %s1375_s22, 5  ;;  %vm774_vm0 = vcmp.lt.s32.totalorder %v760_v54, 256 }
 0x1da   : > { %v759_v59 = vunpack.c.0.s8 %v758_v53  ;;  %s322_s2 = scalar_lea.vmem [#allocation11], %s974_s14  ;;  %s1693_s10 = scalar_lea.hbm %s1742_s5, %s986_s11 }
 0x1db   : > { %v747_v51 = vrot.slane %v746_v49, 2  ;;  %v735_v55 = vadd.f32 %v734_v50, %v733_v48  ;;  %s813_s16 = sshll.u32 %s322_s2, 4  ;;  %s783_s28 = scalar_lea.sflag [#allocation12], %s1575_s13  ;;  %s1695_s16 = int_to_ptr.vmem [resolvable:$true] %s813_s16 }
 0x1dc   : > { %v762_v1 = vsub.s32 %v759_v59, %v761_v60  ;;  %s1229_s0 = scalar_lea.vmem %s1695_s16, 32  ;;  %s1323_s22 = smov [#allocation11]  }
 0x1dd   : > { %v748_v56 = vadd.f32 %v747_v51, %v746_v49  ;;  %v736_v57 = vrot.slane %v735_v55, 1  ;;  %p1230_p4 = scmp.ne.s32.totalorder %s1695_s16, %s1229_s0  ;;  %s1233_s6 = sshll.u32 %s1323_s22, 4  ;;  %s1234_s6 = int_to_ptr.vmem [resolvable:$false] %s1233_s6 }
 0x1de   : > { %s1235_s12 = scalar_lea.vmem %s1234_s6, 64  ;;  %p1236_p7 = scmp.lt.s32.totalorder %s1695_s16, %s1234_s6 }
 0x1df   : > { %v749_v58 = vrot.slane %v748_v56, 1  ;;  %v737_v61 = vadd.f32 %v736_v57, %v735_v55  ;;  %p1231_p5 = pnand %p1230_p4, %p1768_p13  ;;  %p1237_p9 = scmp.lt.s32.totalorder %s1235_s12, %s1229_s0 }
 0x1e1   : > { %v750_v62 = vadd.f32 %v749_v58, %v748_v56  ;;  %v752_v63 = vmul.f32 0.015625, %v737_v61  ;;  %p1232_p3 = pneg %p1231_p5  ;;  %p1238_p0 = por %p1237_p9, %p1236_p7 }
 0x1e3   : > { %v753_v0 = vmul.f32 0.015625, %v750_v62  ;;  %p1239_p8 = pnand %p1238_p0, %p1232_p3 }
 0x1e5   : > { %v756_v2 = vcombine.low %v752_v63, %v753_v0 }
 0x1e7   : > { %v763_v3 = vrot.slane %v756_v2, %v762_v1 }
 0x1e9   : > { %v770_v4 = vrot.slane %v763_v3, %v762_v1 }
 0x1eb   : > { %776 = vst.msk [vmem:[%s322_s2] sm:$0x3] %vm774_vm0, %v770_v4 }
 0x1ec   : > { %1242 = shalt.err (!%p1239_p8)
}
 0x1ed   : > { %s1243_s13 = scalar_lea.hbm %s1693_s10, 32  ;;  %s1247_s17 = scalar_lea.hbm %s1742_s5, 64 }
 0x1ee   : > { %p1244_p11 = scmp.ne.s32.totalorder %s1693_s10, %s1243_s13  ;;  %p1248_p1 = scmp.lt.u32.totalorder %s1693_s10, %s1742_s5 }
 0x1ef   : > { %p1249_p6 = scmp.lt.u32.totalorder %s1247_s17, %s1243_s13  ;;  %p1251_p4 = scmp.lt.u32.totalorder %s1243_s13, %s1693_s10 }
 0x1f0   : > { %p1245_p2 = pnand %p1244_p11, %p1768_p13 }
 0x1f1   : > { %p1250_p10 = por %p1249_p6, %p1248_p1 }
 0x1f2   : > { %p1246_p12 = pneg %p1245_p2 }
 0x1f3   : > { %p1252_p5 = por %p1251_p4, %p1250_p10 }
 0x1f5   : > { %p1253_p3 = pnand %p1252_p5, %p1246_p12 }
 0x1f7   : > { %1256 = shalt.err (!%p1253_p3)
}
 0x1f8   : > { %1016 = dma.vmem_to_hbm [thread:$0]  (%p1768_p13), %s1695_s16, 32, %s1693_s10, %s783_s28  }
 0x1f9 PF: > { %s825_s8 = sand.u32 1, %s1299_s18   ;;  %p1769_p7 = scmp.ne.s32.totalorder %s1753_s25, 0 }
 0x1fa   : > { %p1770_p9 = scmp.ge.s32.totalorder %s1311_s21, 2  ;;  %s826_s14 = scalar_lea.sflag [#allocation4], %s825_s8 }
 0x1fc   : > { %p1034_p0 = pnand %p1770_p9, %p1769_p7 }
 0x1fe   : > { %1290 = dma.done.wait (!%p1034_p0), %s826_s14, 2048  }
 0x1ff   : > { %1292 = vsyncadd (!%p1034_p0), %s826_s14, 4294965248  ;;  %s835_s11 = scalar_lea.sflag [#allocation12], %s825_s8 }
 0x200   : > { %1294 = dma.done.wait (!%p1034_p0), %s835_s11, 32  }
 0x201   : > { %1296 = vsyncadd (!%p1034_p0), %s835_s11, 4294967264  ;;  %p26_p13 = scmp.ge.s32.totalorder %s1470_s29, 4   ;;  %s1771_s18 = smov %s1303_s19 }
 0x202   : > { %s1772_s19 = smov %s1307_s20  ;;  %s1773_s20 = smov %s1486_s27 }
 0x203   : > { %s1774_s21 = smov %s1470_s29  ;;  %28 = sbr.rel (!%p26_p13) target bundleno = 13 (0xd), region = 119 }
 0x20a   :  { %840 = vsyncpa [#allocation3], 1 }
 0x20b   :  { %842 = vsyncpa [#allocation3 + $0x1], 1 }
 0x20c   :  { %843 = vsyncpa [#allocation6], 1 }
 0x20d   :  { %845 = vsyncpa [#allocation6 + $0x1], 1 }
 0x20e   :  { %846 = vsyncpa [#allocation9], 1 }
 0x20f   :  { %847 = vsyncpa [#allocation4], 1 }
 0x210   :  { %849 = vsyncpa [#allocation4 + $0x1], 1 }
 0x211   :  { %850 = vsyncpa [#allocation12], 1 }
 0x212   :  { %852 = vsyncpa [#allocation12 + $0x1], 1 }

</bundles_post_ra>
